<compile_context>
chip_gen: v7x
topology: tpu7x:2x2x1
jax: 0.10.0
libtpu: 0.0.40
codegen_flags: <defaults>
</compile_context>

<pallas_src>
import jax
import jax.numpy as jnp
import numpy as np
from jax import lax
from jax.experimental import pallas as pl
from jax.experimental.pallas import tpu as pltpu

ALPHA = 0.8          # config['alpha']
BN_EPS = 1e-5        # nn.BatchNorm1d default eps
NORM_EPS = 1e-12     # F.normalize default eps
LANE = 128


def _round_up(x, m):
    return ((x + m - 1) // m) * m


def _pad2d(a, rows, cols):
    pr, pc = rows - a.shape[0], cols - a.shape[1]
    if pr == 0 and pc == 0:
        return a
    return jnp.pad(a, ((0, pr), (0, pc)))


def _choose_sim_tile(n):
    """Stage-2 output tile from {512, 256, 128}: minimize padded-N overshoot,
    prefer the largest tile on ties (512 captures ~all of the tile-size win
    while keeping the double-buffered VMEM cost small on every generation)."""
    best_tile, best_pad = 512, _round_up(max(n, 512), 512)
    for t in (256, 128):
        p = _round_up(max(n, t), t)
        if p < best_pad:
            best_tile, best_pad = t, p
    return best_tile, best_pad


def _choose_row_tile(n_pad, cap=256):
    """Stage-1 row tile: largest power-of-two <= cap dividing n_pad with at
    least 2 grid steps (so the 'parallel' axis can shard across v7x cores)."""
    tm = cap
    while tm > 8 and (n_pad % tm != 0 or n_pad // tm < 2):
        tm //= 2
    if n_pad % tm != 0:
        tm = n_pad
    return tm


# ------------------ Stage 1: MLP + L2-normalize (per row block) ------------------

def _mlp_normalize_kernel(x_ref, w1_ref, b1_ref, w2_ref, b2_ref, z_ref):
    # Linear1 (eval-mode BatchNorm folded into w1/b1): bf16 operands, f32 acc.
    h = jnp.dot(x_ref[...], w1_ref[...], preferred_element_type=jnp.float32)
    h = jnp.maximum(h + b1_ref[...], 0.0)
    # Dropout(0.5) is identity in eval mode.
    # TODO(synk): training-mode dropout mask / batch-stat BatchNorm not implemented.
    z = jnp.dot(h.astype(jnp.bfloat16), w2_ref[...],
                preferred_element_type=jnp.float32)
    z = z + b2_ref[...]
    # F.normalize(p=2, dim=1):  z / max(||z||, eps) == z * rsqrt(max(||z||^2, eps^2))
    sumsq = jnp.sum(z * z, axis=1, keepdims=True)
    z = z * lax.rsqrt(jnp.maximum(sumsq, NORM_EPS * NORM_EPS))
    z_ref[...] = z.astype(z_ref.dtype)


# ------------------ Stage 2: similarity tile + adjacency blend ------------------

def _sim_blend_kernel(zr_ref, zc_ref, adj_ref, out_ref):
    # (TM, H) x (TN, H) contracting H of both -> (TM, TN); no explicit transpose.
    sim = lax.dot_general(
        zr_ref[...], zc_ref[...],
        dimension_numbers=(((1,), (1,)), ((), ())),
        preferred_element_type=jnp.float32)
    out_ref[...] = ALPHA * sim + (1.0 - ALPHA) * adj_ref[...].astype(jnp.float32)


def enhanced_gsl_forward(x, params, adj, *, sim_dtype=jnp.bfloat16):
    """x: (N, C_in) f32, adj: (N, N) f32 -> (N, N) f32 blended similarity."""
    n, c_in = x.shape
    hidden = params["w2"].shape[0]

    tile, n_pad = _choose_sim_tile(n)
    c_pad = _round_up(c_in, LANE)
    h_pad = _round_up(hidden, LANE)

    # Fold eval-mode BatchNorm into Linear1; pad to lane-dense shapes.
    scale = params["gamma"] * lax.rsqrt(params["running_var"] + BN_EPS)   # (1, H)
    w1 = _pad2d(params["w1"] * scale, c_pad, h_pad).astype(jnp.bfloat16)
    b1 = _pad2d((params["b1"] - params["running_mean"]) * scale + params["beta"],
                1, h_pad)                                                  # f32
    w2 = _pad2d(params["w2"], h_pad, h_pad).astype(jnp.bfloat16)
    b2 = _pad2d(params["b2"], 1, h_pad)                                    # f32
    x_p = _pad2d(x, n_pad, c_pad).astype(jnp.bfloat16)
    # adj streamed as bf16 (exact for {0,1} adjacency; halves adj HBM traffic).
    adj_p = _pad2d(adj, n_pad, n_pad).astype(jnp.bfloat16)

    # ---- Stage 1: z = normalize(mlp(x)), tiled over row blocks, bf16 output. ----
    tm = _choose_row_tile(n_pad)
    const_buf = pl.Buffered(1)   # constant-index blocks: no dead second buffer
    z = pl.pallas_call(
        _mlp_normalize_kernel,
        out_shape=jax.ShapeDtypeStruct((n_pad, h_pad), sim_dtype),
        grid_spec=pltpu.PrefetchScalarGridSpec(
            num_scalar_prefetch=0,
            grid=(n_pad // tm,),
            in_specs=[
                pl.BlockSpec((tm, c_pad), lambda i: (i, 0)),
                pl.BlockSpec((c_pad, h_pad), lambda i: (0, 0),
                             pipeline_mode=const_buf),
                pl.BlockSpec((1, h_pad), lambda i: (0, 0),
                             pipeline_mode=const_buf),
                pl.BlockSpec((h_pad, h_pad), lambda i: (0, 0),
                             pipeline_mode=const_buf),
                pl.BlockSpec((1, h_pad), lambda i: (0, 0),
                             pipeline_mode=const_buf),
            ],
            out_specs=pl.BlockSpec((tm, h_pad), lambda i: (i, 0)),
        ),
        compiler_params=pltpu.CompilerParams(
            dimension_semantics=("parallel",),
            vmem_limit_bytes=32 * 1024 * 1024),
    )(x_p, w1, b1, w2, b2)

    # ---- Stage 2: sim tile + blend, 2-D parallel grid over the (N, N) output. ----
    grid = (n_pad // tile, n_pad // tile)
    z_bytes = 2 * grid[0] * n_pad * h_pad * np.dtype(sim_dtype).itemsize
    cost = pl.CostEstimate(
        flops=2 * n_pad * n_pad * h_pad + 3 * n_pad * n_pad,
        transcendentals=0,
        bytes_accessed=n_pad * n_pad * (4 + 2) + z_bytes)   # out f32 + adj bf16 + z
    out_p = pl.pallas_call(
        _sim_blend_kernel,
        out_shape=jax.ShapeDtypeStruct((n_pad, n_pad), jnp.float32),
        grid_spec=pltpu.PrefetchScalarGridSpec(
            num_scalar_prefetch=0,
            grid=grid,
            in_specs=[
                pl.BlockSpec((tile, h_pad), lambda i, j: (i, 0)),   # z row panel
                pl.BlockSpec((tile, h_pad), lambda i, j: (j, 0)),   # z col panel
                pl.BlockSpec((tile, tile), lambda i, j: (i, j)),    # adj tile (bf16)
            ],
            out_specs=pl.BlockSpec((tile, tile), lambda i, j: (i, j)),
        ),
        compiler_params=pltpu.CompilerParams(
            dimension_semantics=("parallel", "parallel"),
            vmem_limit_bytes=32 * 1024 * 1024),
        cost_estimate=cost,
    )(z, z, adj_p)

    return out_p[:n, :n]


def init_params(key, in_channel, hidden_channel):
    """Deterministic synthetic parameters (shapes match the PyTorch module)."""
    k1, k2, k3, k4 = jax.random.split(key, 4)
    scale1 = 1.0 / np.sqrt(in_channel)
    scale2 = 1.0 / np.sqrt(hidden_channel)
    return {
        # Linear(in_channel, hidden) -- stored transposed: (C_in, H)
        "w1": jax.random.uniform(k1, (in_channel, hidden_channel),
                                 jnp.float32, -scale1, scale1),
        "b1": jax.random.uniform(k2, (1, hidden_channel),
                                 jnp.float32, -scale1, scale1),
        # BatchNorm1d(hidden)
        "gamma": jnp.ones((1, hidden_channel), jnp.float32),
        "beta": jnp.zeros((1, hidden_channel), jnp.float32),
        "running_mean": jnp.zeros((1, hidden_channel), jnp.float32),
        "running_var": jnp.ones((1, hidden_channel), jnp.float32),
        # Linear(hidden, hidden) -- stored transposed: (H, H)
        "w2": jax.random.uniform(k3, (hidden_channel, hidden_channel),
                                 jnp.float32, -scale2, scale2),
        "b2": jax.random.uniform(k4, (1, hidden_channel),
                                 jnp.float32, -scale2, scale2),
    }


def reference_forward(x, params, adj):
    """Pure-JAX reference (eval-mode PyTorch semantics, full f32)."""
    h = x @ params["w1"] + params["b1"]
    h = (h - params["running_mean"]) / jnp.sqrt(params["running_var"] + BN_EPS)
    h = h * params["gamma"] + params["beta"]
    h = jnp.maximum(h, 0.0)
    z = h @ params["w2"] + params["b2"]
    norm = jnp.sqrt(jnp.sum(z * z, axis=1, keepdims=True))
    z = z / jnp.maximum(norm, NORM_EPS)
    sim = z @ z.T
    return ALPHA * sim + (1.0 - ALPHA) * adj


if __name__ == "__main__":
    N, IN_CH, HIDDEN = 8, 16, 32

    key = jax.random.PRNGKey(0)
    kx, kadj, kp = jax.random.split(key, 3)

    x = jax.random.normal(kx, (N, IN_CH), jnp.float32)
    # Symmetric {0,1} adjacency with self-loops, like a typical original_adj.
    a = (jax.random.uniform(kadj, (N, N)) > 0.5).astype(jnp.float32)
    adj = jnp.clip(a + a.T + jnp.eye(N, dtype=jnp.float32), 0.0, 1.0)

    params = init_params(kp, IN_CH, HIDDEN)

    out = enhanced_gsl_forward(x, params, adj)
    out = jax.block_until_ready(out)

    ref = reference_forward(x, params, adj)
    # x/w1/w2/z are cast to bf16 for the MXU (f32 accumulation), so tolerance
    # is relaxed accordingly (typical error a few 1e-3 for unit-norm rows).
    np.testing.assert_allclose(np.asarray(out), np.asarray(ref),
                               rtol=2e-2, atol=2e-2)

    print("KERNEL_OK")
</pallas_src>

<mosaic_0001>
module attributes {stable_mosaic.version = 11 : i64} {
  func.func @_mlp_normalize_kernel(%arg0: i32, %arg1: memref<64x128xbf16, #tpu.memory_space<vmem>>, %arg2: memref<128x128xbf16, #tpu.memory_space<vmem>>, %arg3: memref<1x128xf32, #tpu.memory_space<vmem>>, %arg4: memref<128x128xbf16, #tpu.memory_space<vmem>>, %arg5: memref<1x128xf32, #tpu.memory_space<vmem>>, %arg6: memref<64x128xbf16, #tpu.memory_space<vmem>>) attributes {dimension_semantics = [#tpu.dimension_semantics<parallel>], iteration_bounds = array<i64: 2>, scalar_prefetch = 0 : i64, scratch_operands = 0 : i64, tpu.core_type = #tpu.core_type<tc>, window_params = [{transform_indices = @transform_0, window_bounds = array<i64: 64, 128>}, {pipeline_mode = #tpu.pipeline_mode<synchronous>, transform_indices = @transform_1, window_bounds = array<i64: 128, 128>}, {pipeline_mode = #tpu.pipeline_mode<synchronous>, transform_indices = @transform_2, window_bounds = array<i64: 1, 128>}, {pipeline_mode = #tpu.pipeline_mode<synchronous>, transform_indices = @transform_3, window_bounds = array<i64: 128, 128>}, {pipeline_mode = #tpu.pipeline_mode<synchronous>, transform_indices = @transform_4, window_bounds = array<i64: 1, 128>}, {transform_indices = @transform_5, window_bounds = array<i64: 64, 128>}]} {
    %c0 = arith.constant 0 : index
    %c0_0 = arith.constant 0 : index
    %0 = vector.load %arg1[%c0, %c0_0] : memref<64x128xbf16, #tpu.memory_space<vmem>>, vector<64x128xbf16>
    %c0_1 = arith.constant 0 : index
    %c0_2 = arith.constant 0 : index
    %1 = vector.load %arg2[%c0_1, %c0_2] : memref<128x128xbf16, #tpu.memory_space<vmem>>, vector<128x128xbf16>
    %cst = arith.constant dense<0.000000e+00> : vector<64x128xf32>
    %2 = tpu.matmul %0, %1, %cst {dimension_numbers = #tpu.dot_dimension_numbers<[1], [0], [0], [1], [0, 0, 1, 1], [], []>} : vector<64x128xbf16>, vector<128x128xbf16>, vector<64x128xf32> -> vector<64x128xf32>
    %c0_3 = arith.constant 0 : index
    %c0_4 = arith.constant 0 : index
    %3 = vector.load %arg3[%c0_3, %c0_4] : memref<1x128xf32, #tpu.memory_space<vmem>>, vector<1x128xf32>
    %4 = vector.broadcast %3 : vector<1x128xf32> to vector<64x128xf32>
    %5 = arith.addf %2, %4 : vector<64x128xf32>
    %cst_5 = arith.constant 0.000000e+00 : f32
    %6 = vector.broadcast %cst_5 : f32 to vector<64x128xf32>
    %7 = arith.maximumf %5, %6 : vector<64x128xf32>
    %8 = arith.truncf %7 : vector<64x128xf32> to vector<64x128xbf16>
    %c0_6 = arith.constant 0 : index
    %c0_7 = arith.constant 0 : index
    %9 = vector.load %arg4[%c0_6, %c0_7] : memref<128x128xbf16, #tpu.memory_space<vmem>>, vector<128x128xbf16>
    %cst_8 = arith.constant dense<0.000000e+00> : vector<64x128xf32>
    %10 = tpu.matmul %8, %9, %cst_8 {dimension_numbers = #tpu.dot_dimension_numbers<[1], [0], [0], [1], [0, 0, 1, 1], [], []>} : vector<64x128xbf16>, vector<128x128xbf16>, vector<64x128xf32> -> vector<64x128xf32>
    %c0_9 = arith.constant 0 : index
    %c0_10 = arith.constant 0 : index
    %11 = vector.load %arg5[%c0_9, %c0_10] : memref<1x128xf32, #tpu.memory_space<vmem>>, vector<1x128xf32>
    %12 = vector.broadcast %11 : vector<1x128xf32> to vector<64x128xf32>
    %13 = arith.addf %10, %12 : vector<64x128xf32>
    %14 = arith.mulf %13, %13 : vector<64x128xf32>
    %cst_11 = arith.constant dense<0.000000e+00> : vector<64xf32>
    %15 = vector.multi_reduction <add>, %14, %cst_11 [1] : vector<64x128xf32> to vector<64xf32>
    %16 = vector.shape_cast %15 : vector<64xf32> to vector<64x1xf32>
    %cst_12 = arith.constant 1.000000e-24 : f32
    %17 = vector.broadcast %cst_12 : f32 to vector<64x1xf32>
    %18 = arith.maximumf %16, %17 : vector<64x1xf32>
    %19 = math.rsqrt %18 : vector<64x1xf32>
    %20 = vector.broadcast %19 : vector<64x1xf32> to vector<64x128xf32>
    %21 = arith.mulf %13, %20 : vector<64x128xf32>
    %22 = arith.truncf %21 : vector<64x128xf32> to vector<64x128xbf16>
    %c0_13 = arith.constant 0 : index
    %c0_14 = arith.constant 0 : index
    %23 = vector.load %arg6[%c0_13, %c0_14] : memref<64x128xbf16, #tpu.memory_space<vmem>>, vector<64x128xbf16>
    tpu.vector_store %arg6[%c0_13, %c0_14], %22 {strides = array<i32>} : memref<64x128xbf16, #tpu.memory_space<vmem>>, vector<64x128xbf16>,
    return
  }
  func.func @transform_0(%arg0: i32) -> (i32, i32) {
    %c0_i32 = arith.constant 0 : i32
    %c0_i32_0 = arith.constant 0 : i32
    return %arg0, %c0_i32 : i32, i32
  }
  func.func @transform_1(%arg0: i32) -> (i32, i32) {
    %c0_i32 = arith.constant 0 : i32
    %c0_i32_0 = arith.constant 0 : i32
    %c0_i32_1 = arith.constant 0 : i32
    return %c0_i32, %c0_i32_0 : i32, i32
  }
  func.func @transform_2(%arg0: i32) -> (i32, i32) {
    %c0_i32 = arith.constant 0 : i32
    %c0_i32_0 = arith.constant 0 : i32
    %c0_i32_1 = arith.constant 0 : i32
    return %c0_i32, %c0_i32_0 : i32, i32
  }
  func.func @transform_3(%arg0: i32) -> (i32, i32) {
    %c0_i32 = arith.constant 0 : i32
    %c0_i32_0 = arith.constant 0 : i32
    %c0_i32_1 = arith.constant 0 : i32
    return %c0_i32, %c0_i32_0 : i32, i32
  }
  func.func @transform_4(%arg0: i32) -> (i32, i32) {
    %c0_i32 = arith.constant 0 : i32
    %c0_i32_0 = arith.constant 0 : i32
    %c0_i32_1 = arith.constant 0 : i32
    return %c0_i32, %c0_i32_0 : i32, i32
  }
  func.func @transform_5(%arg0: i32) -> (i32, i32) {
    %c0_i32 = arith.constant 0 : i32
    %c0_i32_0 = arith.constant 0 : i32
    return %arg0, %c0_i32 : i32, i32
  }
}

</mosaic_0001>

<bundles_post_ra>
// kernel: tpu_custom_call.1
= control target key start
LH: loop header
LB: loop body
LE: loop exit
PB: predicated region body
PF: predicated region fallthrough
CT: control target
= control target key end

     0   :  { %10 = vsyncpa [#allocation3], 0  ;;  %s1500_s0 = inlined_call_operand.hbm [shape: bf16[128,128], index: 0, kind: input, shape index: {}]   ;;  %s1501_s1 = inlined_call_operand.hbm [shape: bf16[128,128], index: 1, kind: input, shape index: {}]   ;;  %s1502_s2 = inlined_call_operand.vmem [shape: f32[1,128], index: 2, kind: input, shape index: {}]   ;;  %s1503_s3 = inlined_call_operand.hbm [shape: bf16[128,128], index: 3, kind: input, shape index: {}]   ;;  %s1504_s4 = inlined_call_operand.vmem [shape: f32[1,128], index: 4, kind: input, shape index: {}]   ;;  %s1505_s5 = inlined_call_operand.hbm [shape: bf16[128,128], index: 5, kind: output, shape index: {}]  }
   0x1   :  { %12 = vsyncpa [#allocation3 + $0x1], 0 }
   0x2   :  { %13 = vsyncpa [#allocation6], 0 }
   0x3   :  { %14 = vsyncpa [#allocation4], 0 }
   0x4   :  { %16 = vsyncpa [#allocation4 + $0x1], 0  ;;  %s1241_s18 = smov 0   ;;  %s1243_s19 = smov 0  }
   0x5   :  { %s1245_s20 = smov 0   ;;  %s1247_s21 = smov 0  }
   0x6 LB: > { %s1262_s22 = sadd.s32 4294967295, %s1201_s21   ;;  %s785_s23 = sadd.s32 4294967294, %s1201_s21   ;;  %s1201_s21 = sphi %s1247_s21, %s1525_s21   ;;  %s1197_s20 = sphi %s1245_s20, %s1524_s20   ;;  %s1193_s19 = sphi %s1243_s19, %s1523_s19   ;;  %s1189_s18 = sphi %s1241_s18, %s1522_s18  }
   0x7   : > { %p42_p0 = scmp.ne.s32.totalorder %s1193_s19, %s1189_s18  ;;  %p1506_p1 = scmp.eq.s32.totalorder %s1262_s22, 0 }
   0x8   : > { %p156_p3 = scmp.eq.s32.totalorder %s785_s23, 1  ;;  %p786_p5 = scmp.ge.s32.totalorder %s1201_s21, 1 }
   0x9   : > { %p1271_p4 = por %p1506_p1, %p42_p0  ;;  %p163_p7 = scmp.lt.s32.totalorder %s1201_s21, 3 }
   0xa   : > { %p1276_p6 = por %p156_p3, %p42_p0  ;;  %s1203_s27 = smov [#allocation5]  }
   0xb   : > { %s1509_s24 = scalar_select %p1271_p4, 1, 0 }
   0xc   : > { %s1510_s25 = scalar_select %p1276_p6, 1, 0 }
   0xd   : > { %p1281_p8 = pnand %p786_p5, %p163_p7  ;;  %s175_s28 = sshll.u32 %s1203_s27, 4  ;;  %s1285_s28 = int_to_ptr.vmem [resolvable:$true] %s175_s28 }
   0xe   : > { %s1204_s30 = smov [#allocation7]   ;;  %s1045_s9 = scalar_lea.hbm %s1501_s1, 1024 }
   0xf   : > { %p950_p9 = pneg %p1281_p8  ;;  %s191_s6 = sshll.u32 %s1204_s30, 4  ;;  %s1296_s6 = int_to_ptr.vmem [resolvable:$true] %s191_s6 }
  0x10   : > { %p1046_p12 = scmp.ne.s32.totalorder %s1501_s1, %s1045_s9  ;;  %p1052_p5 = scmp.lt.u32.totalorder %s1045_s9, %s1501_s1 }
  0x11   : > { %p1292_p11 = pnand %p950_p9, %p1506_p1 }
  0x13   : > { %p1047_p13 = pneg %p1292_p11 }
  0x15   : > { %p1048_p0 = pnand %p1047_p13, %p1046_p12 }
  0x17   : > { %p1049_p3 = pneg %p1048_p0 }
  0x19   : > { %p1054_p7 = pnand %p1052_p5, %p1049_p3 }
  0x1b   : > { %1057 = shalt.err (!%p1054_p7)
}
  0x1c   : > { %s1058_s14 = scalar_lea.vmem %s1285_s28, 1024  ;;  %p1066_p2 = scmp.lt.s32.totalorder %s1285_s28, %s1285_s28 }
  0x1d   : > { %p1059_p9 = scmp.ne.s32.totalorder %s1285_s28, %s1058_s14  ;;  %p1067_p12 = scmp.lt.s32.totalorder %s1058_s14, %s1058_s14 }
  0x1f   : > { %p1061_p10 = pnand %p1059_p9, %p1047_p13  ;;  %p1068_p0 = por %p1067_p12, %p1066_p2 }
  0x21   : > { %p1062_p1 = pneg %p1061_p10 }
  0x23   : > { %p1069_p6 = pnand %p1068_p0, %p1062_p1 }
  0x25   : > { %1072 = shalt.err (!%p1069_p6)
}
  0x26   : > { %s1205_s15 = smov 64   ;;  %s1206_s16 = smov 4  }
  0x27   : > { %953 = dma.hbm_to_vmem [thread:$0]  (!%p1292_p11), %s1501_s1, 1024, %s1285_s28, [#allocation6], %s1205_s15, %s1205_s15, %s1206_s16  }
  0x28   : > { %s1073_s7 = scalar_lea.hbm %s1503_s3, 1024 }
  0x29   : > { %p1074_p1 = scmp.ne.s32.totalorder %s1503_s3, %s1073_s7  ;;  %p1080_p10 = scmp.lt.u32.totalorder %s1073_s7, %s1503_s3 }
  0x2b   : > { %p1076_p2 = pnand %p1074_p1, %p1047_p13 }
  0x2d   : > { %p1077_p6 = pneg %p1076_p2 }
  0x2f   : > { %p1082_p3 = pnand %p1080_p10, %p1077_p6 }
  0x31   : > { %1085 = shalt.err (!%p1082_p3)
}
  0x32   : > { %s1086_s28 = scalar_lea.vmem %s1296_s6, 1024  ;;  %p1094_p12 = scmp.lt.s32.totalorder %s1296_s6, %s1296_s6 }
  0x33   : > { %p1087_p5 = scmp.ne.s32.totalorder %s1296_s6, %s1086_s28  ;;  %p1095_p0 = scmp.lt.s32.totalorder %s1086_s28, %s1086_s28 }
  0x35   : > { %p1089_p7 = pnand %p1087_p5, %p1047_p13  ;;  %p1096_p1 = por %p1095_p0, %p1094_p12 }
  0x37   : > { %p1090_p9 = pneg %p1089_p7 }
  0x39   : > { %p1097_p2 = pnand %p1096_p1, %p1090_p9 }
  0x3b   : > { %1100 = shalt.err (!%p1097_p2)
}
  0x3c   : > { %956 = dma.hbm_to_vmem [thread:$0]  (!%p1292_p11), %s1503_s3, 1024, %s1296_s6, [#allocation6], %s1205_s15, %s1205_s15, %s1206_s16  }
  0x3d   : > { %s1357_s29 = sadd.s32 1, %s1201_s21   ;;  %s29_s14 = sadd.s32 1, %s1197_s20 }
  0x3e   : > { %s26_s17 = ssub.s32 %s1201_s21, %s1357_s29  ;;  %p36_p13 = scmp.ne.s32.totalorder %s1197_s20, %s1193_s19 }
  0x3f   : > { %p27_p6 = scmp.eq.s32.totalorder %s26_s17, 0  ;;  %p37_p10 = scmp.eq.s32.totalorder %s1201_s21, 0 }
  0x40   : > { %p1513_p3 = scmp.eq.s32.totalorder %s1262_s22, 1  ;;  %p967_p7 = scmp.lt.s32.totalorder %s1201_s21, 2 }
  0x41   : > { %s1373_s27 = scalar_select %p27_p6, %s1197_s20, %s29_s14  }
  0x42   : > { %p1367_p5 = por %p1513_p3, %p36_p13  ;;  %p38_p9 = por %p37_p10, %p36_p13 }
  0x43   : > { %s208_s30 = sand.u32 1, %s1197_s20   ;;  %s833_s6 = sshll.u32 %s1201_s21, 9 }
  0x44   : > { %s1514_s23 = scalar_select %p1367_p5, 1, 0 }
  0x45   : > { %s790_s7 = sshll.u32 %s208_s30, 5  ;;  %s1380_s10 = scalar_lea.hbm %s1500_s0, %s833_s6 }
  0x46   : > { %s212_s11 = scalar_lea.vmem [#allocation2], %s790_s7  ;;  %p1384_p11 = pnand %p967_p7, %p38_p9 }
  0x47   : > { %s219_s28 = sshll.u32 %s212_s11, 4  ;;  %s1388_s13 = scalar_lea.sflag [#allocation3], %s208_s30  ;;  %s1382_s28 = int_to_ptr.vmem [resolvable:$true] %s219_s28 }
  0x48   : > { %s1101_s14 = scalar_lea.hbm %s1380_s10, 512  ;;  %p1103_p0 = pneg %p1384_p11 }
  0x49   : > { %p1102_p12 = scmp.ne.s32.totalorder %s1380_s10, %s1101_s14  ;;  %s1106_s6 = scalar_lea.hbm %s1500_s0, 1024 }
  0x4a   : > { %p1107_p13 = scmp.lt.u32.totalorder %s1380_s10, %s1500_s0  ;;  %p1108_p6 = scmp.lt.u32.totalorder %s1106_s6, %s1101_s14 }
  0x4b   : > { %p1104_p1 = pnand %p1103_p0, %p1102_p12  ;;  %p1110_p3 = scmp.lt.u32.totalorder %s1101_s14, %s1380_s10 }
  0x4c   : > { %p1109_p10 = por %p1108_p6, %p1107_p13 }
  0x4d   : > { %p1105_p2 = pneg %p1104_p1 }
  0x4e   : > { %p1111_p7 = por %p1110_p3, %p1109_p10 }
  0x50   : > { %p1112_p9 = pnand %p1111_p7, %p1105_p2 }
  0x52   : > { %1115 = shalt.err (!%p1112_p9)
}
  0x53   : > { %s1116_s30 = scalar_lea.vmem %s1382_s28, 512  ;;  %s1207_s11 = smov [#allocation2]  }
  0x54   : > { %p1117_p12 = scmp.ne.s32.totalorder %s1382_s28, %s1116_s30  ;;  %s1121_s17 = sshll.u32 %s1207_s11, 4  ;;  %s1122_s17 = int_to_ptr.vmem [resolvable:$false] %s1121_s17 }
  0x55   : > { %s1123_s7 = scalar_lea.vmem %s1122_s17, 1024  ;;  %p1124_p4 = scmp.lt.s32.totalorder %s1382_s28, %s1122_s17 }
  0x56   : > { %p1119_p1 = pnand %p1117_p12, %p1103_p0  ;;  %p1125_p13 = scmp.lt.s32.totalorder %s1123_s7, %s1116_s30 }
  0x58   : > { %p1120_p5 = pneg %p1119_p1  ;;  %p1126_p6 = por %p1125_p13, %p1124_p4 }
  0x5a   : > { %p1127_p10 = pnand %p1126_p6, %p1120_p5 }
  0x5c   : > { %1130 = shalt.err (!%p1127_p10)
}
  0x5d   : > { %960 = dma.hbm_to_vmem [thread:$0]  (!%p1384_p11), %s1380_s10, 512, %s1382_s28, %s1388_s13, %s1205_s15, %s1205_s15, %s1206_s16  }
  0x5e   : > { %231 = sbr.rel (%p1281_p8) target bundleno = 765 (0x2fd), region = 40  ;;  %s1422_s14 = sand.u32 (!%p1281_p8), 1, %s1193_s19  }
  0x5f   : > { %s794_s6 = sshll.u32 (!%p1281_p8), %s1422_s14, 5  ;;  %s234_s8 = scalar_lea.sflag (!%p1281_p8), [#allocation3], %s1422_s14 }
  0x60   : > { %s1428_s12 = scalar_lea.vmem (!%p1281_p8), [#allocation2], %s794_s6  ;;  %p1516_p4 = scmp.ne.s32.totalorder (!%p1281_p8), %s1509_s24, 0 }
  0x65   : > { %1176 = dma.done.wait (%p1516_p4), %s234_s8, 512  }
  0x66   : > { %1178 = vsyncadd (%p1516_p4), %s234_s8, 4294966784  ;;  %p1517_p5 = scmp.eq.s32.totalorder %s1262_s22, 0 }
  0x68   : > { %1180 = dma.done.wait (%p1517_p5), [#allocation6], 2048   ;;  %p1518_p8 = pmov %p1517_p5 }
  0x69   : > { %v1009_v0 = vld [vmem:[#allocation5] sm:$0xff]   ;;  %v1010_v1 = vld [vmem:[#allocation5 + $0x8] sm:$0xff]   ;;  %v1011_v2 = vld [vmem:[#allocation5 + $0x10] sm:$0xff]   ;;  %s271_s10 = scalar_lea.vmem [#allocation8], %s794_s6  ;;  %s842_s28 = sshll.u32 %s1262_s22, 9 }
  0x6a   : > { %1182 = vsyncadd (%p1518_p8), [#allocation6], 4294965248  ;;  %890 = vmatprep.subr.bf16.mxu0 %v1009_v0  ;;  %v1012_v3 = vld [vmem:[#allocation5 + $0x18] sm:$0xff]   ;;  %v1017_v4 = vld [vmem:[%s1428_s12] sm:$0xff]   ;;  %s693_s13 = sshll.u32 %s271_s10, 4  ;;  %s1454_s11 = scalar_lea.hbm %s1505_s5, %s842_s28  ;;  %s1456_s13 = int_to_ptr.vmem [resolvable:$true] %s693_s13 }
  0x6b   : > { %891 = vmatpush3.bf16.msra.mxu0 %v1009_v0  ;;  %906 = vmatprep.mubr.bf16.mxu0 %v1017_v4  ;;  %v1013_v5 = vld [vmem:[#allocation5 + $0x20] sm:$0xff]   ;;  %v1022_v7 = vld [vmem:[#allocation7 + $0x8] sm:$0xff]   ;;  %v1023_v9 = vld [vmem:[#allocation7 + $0x10] sm:$0xff]   ;;  %s680_s17 = scalar_lea.sflag [#allocation4], %s1422_s14  ;;  %s1131_s7 = scalar_lea.vmem %s1456_s13, 512 }
  0x6c   : > { %892 = vmatprep.subr.bf16.mxu0 %v1010_v1  ;;  %v1021_v6 = vld [vmem:[#allocation7] sm:$0xff]   ;;  %v1014_v8 = vld [vmem:[#allocation5 + $0x28] sm:$0xff]   ;;  %v1015_v10 = vld [vmem:[#allocation5 + $0x30] sm:$0xff]   ;;  %p1132_p11 = scmp.ne.s32.totalorder %s1456_s13, %s1131_s7  ;;  %p1519_p0 = scmp.ne.s32.totalorder %s1514_s23, 0 }
  0x6d   : > { %914 = vmatprep.subr.bf16.mxu1 %v1021_v6  ;;  %v1024_v11 = vld [vmem:[#allocation7 + $0x18] sm:$0xff]   ;;  %v1025_v13 = vld [vmem:[#allocation7 + $0x20] sm:$0xff]   ;;  %v1026_v14 = vld [vmem:[#allocation7 + $0x28] sm:$0xff]   ;;  %s1208_s22 = smov [#allocation8]  }
  0x6e   : > { %915 = vmatpush3.bf16.msra.mxu1 %v1021_v6  ;;  %v1016_v12 = vld [vmem:[#allocation5 + $0x38] sm:$0xff]   ;;  %v1018_v15 = vld [vmem:[%s1428_s12 + $0x8] sm:$0xff]   ;;  %v1019_v16 = vld [vmem:[%s1428_s12 + $0x10] sm:$0xff]   ;;  %p1133_p2 = pnand %p1132_p11, %p1519_p0  ;;  %s1135_s6 = sshll.u32 %s1208_s22, 4  ;;  %s1136_s6 = int_to_ptr.vmem [resolvable:$false] %s1135_s6 }
  0x6f   : > { %893 = vmatpush3.bf16.msra.mxu0 %v1010_v1  ;;  %916 = vmatprep.subr.bf16.mxu1 %v1022_v7  ;;  %v1020_v17 = vld [vmem:[%s1428_s12 + $0x18] sm:$0xff]   ;;  %v1027_v18 = vld [vmem:[#allocation7 + $0x30] sm:$0xff]   ;;  %v798_v20 = vld [vmem:[%s1502_s2] ss:$0 sm:$0xff]  ;;  %s1137_s8 = scalar_lea.vmem %s1136_s6, 1024  ;;  %p1138_p7 = scmp.lt.s32.totalorder %s1456_s13, %s1136_s6 }
  0x70   : > { %894 = vmatprep.subr.bf16.mxu0 %v1011_v2  ;;  %v1028_v19 = vld [vmem:[#allocation7 + $0x38] sm:$0xff]   ;;  %v811_v49 = vld [vmem:[%s1504_s4] ss:$0 sm:$0xff]  ;;  %p1134_p3 = pneg %p1133_p2  ;;  %p1139_p9 = scmp.lt.s32.totalorder %s1137_s8, %s1131_s7 }
  0x72   : > { %917 = vmatpush3.bf16.msra.mxu1 %v1022_v7  ;;  %p1140_p12 = por %p1139_p9, %p1138_p7 }
  0x73   : > { %895 = vmatpush3.bf16.msra.mxu0 %v1011_v2  ;;  %918 = vmatprep.subr.bf16.mxu1 %v1023_v9 }
  0x74   : > { %896 = vmatprep.subr.bf16.mxu0 %v1012_v3  ;;  %p1141_p1 = pnand %p1140_p12, %p1134_p3 }
  0x76   : > { %919 = vmatpush3.bf16.msra.mxu1 %v1023_v9 }
  0x77   : > { %897 = vmatpush3.bf16.msra.mxu0 %v1012_v3  ;;  %920 = vmatprep.subr.bf16.mxu1 %v1024_v11 }
  0x78   : > { %898 = vmatprep.subr.bf16.mxu0 %v1013_v5 }
  0x7a   : > { %921 = vmatpush3.bf16.msra.mxu1 %v1024_v11 }
  0x7b   : > { %899 = vmatpush3.bf16.msra.mxu0 %v1013_v5  ;;  %922 = vmatprep.subr.bf16.mxu1 %v1025_v13 }
  0x7c   : > { %900 = vmatprep.subr.bf16.mxu0 %v1014_v8 }
  0x7e   : > { %923 = vmatpush3.bf16.msra.mxu1 %v1025_v13 }
  0x7f   : > { %901 = vmatpush3.bf16.msra.mxu0 %v1014_v8  ;;  %924 = vmatprep.subr.bf16.mxu1 %v1026_v14 }
  0x80   : > { %902 = vmatprep.subr.bf16.mxu0 %v1015_v10 }
  0x82   : > { %925 = vmatpush3.bf16.msra.mxu1 %v1026_v14 }
  0x83   : > { %903 = vmatpush3.bf16.msra.mxu0 %v1015_v10  ;;  %926 = vmatprep.subr.bf16.mxu1 %v1027_v18 }
  0x84   : > { %904 = vmatprep.subr.bf16.mxu0 %v1016_v12 }
  0x86   : > { %927 = vmatpush3.bf16.msra.mxu1 %v1027_v18 }
  0x87   : > { %905 = vmatpush3.bf16.msra.mxu0 %v1016_v12  ;;  %928 = vmatprep.subr.bf16.mxu1 %v1028_v19 }
  0x8a   : > { %907 = vmatmul.mubr.bf16.vlgmr.msra.gmra.mrb[0].mxu0 %v1018_v15  ;;  %929 = vmatpush3.bf16.msra.mxu1 %v1028_v19 }
  0x8b   : > { %910 = vmatprep.mubr.bf16.mxu0 %v1019_v16 }
  0x92   : > { %911 = vmatmul.mubr.bf16.gmra.mrb[4].mxu0 %v1020_v17 }
 0x15d   : > { %v908_v21 = vpop.f32.mrb[0].mxu0 }
 0x15e   : > { %v421_v22 = vadd.f32 %v908_v21, %v798_v20  ;;  %v412_v23 = vpop.f32.mrb[1].mxu0 }
 0x15f   : > { %v413_v24 = vadd.f32 %v798_v20, %v412_v23  ;;  %v909_v25 = vpop.f32.mrb[2].mxu0 }
 0x160   : > { %v424_v26 = vadd.f32 %v909_v25, %v798_v20  ;;  %v415_v27 = vpop.f32.mrb[3].mxu0  ;;  %v445_v29 = vmax.f32 %v421_v22, 0.0 }
 0x161   : > { %v416_v28 = vadd.f32 %v798_v20, %v415_v27  ;;  %v443_v31 = vmax.f32 %v413_v24, 0.0 }
 0x162   : > { %v446_v30 = vmax.f32 %v424_v26, 0.0 }
 0x163   : > { %v444_v32 = vmax.f32 %v416_v28, 0.0 }
 0x164   : > { %v452_v33 = vpack.c.bf16 %v446_v30, %v445_v29 }
 0x165   : > { %v912_v34 = vpop.f32.mrb[4].mxu0  ;;  %v451_v35 = vpack.c.bf16 %v444_v32, %v443_v31 }
 0x166   : > { %v437_v36 = vadd.f32 %v912_v34, %v798_v20  ;;  %v428_v37 = vpop.f32.mrb[5].mxu0 }
 0x167   : > { %v429_v38 = vadd.f32 %v798_v20, %v428_v37  ;;  %v913_v39 = vpop.f32.mrb[6].mxu0  ;;  %930 = vmatprep.mubr.bf16.mxu1 %v451_v35 }
 0x168   : > { %v440_v40 = vadd.f32 %v913_v39, %v798_v20  ;;  %v431_v41 = vpop.f32.mrb[7].mxu0  ;;  %931 = vmatmul.mubr.bf16.vlgmr.msra.gmra.mrb[0].mxu1 %v452_v33  ;;  %v449_v43 = vmax.f32 %v437_v36, 0.0 }
 0x169   : > { %v432_v42 = vadd.f32 %v798_v20, %v431_v41  ;;  %v447_v45 = vmax.f32 %v429_v38, 0.0 }
 0x16a   : > { %v450_v44 = vmax.f32 %v440_v40, 0.0 }
 0x16b   : > { %v448_v46 = vmax.f32 %v432_v42, 0.0 }
 0x16c   : > { %v454_v47 = vpack.c.bf16 %v450_v44, %v449_v43 }
 0x16d   : > { %v453_v48 = vpack.c.bf16 %v448_v46, %v447_v45 }
 0x16f   : > { %934 = vmatprep.mubr.bf16.mxu1 %v453_v48 }
 0x170   : > { %935 = vmatmul.mubr.bf16.gmra.mrb[4].mxu1 %v454_v47 }
 0x23b   : > { %v932_v50 = vpop.f32.mrb[0].mxu1 }
 0x23c   : > { %v569_v51 = vadd.f32 %v932_v50, %v811_v49  ;;  %v560_v52 = vpop.f32.mrb[1].mxu1 }
 0x23d   : > { %v561_v53 = vadd.f32 %v811_v49, %v560_v52  ;;  %v933_v54 = vpop.f32.mrb[2].mxu1 }
 0x23e   : > { %v572_v55 = vadd.f32 %v933_v54, %v811_v49  ;;  %v563_v56 = vpop.f32.mrb[3].mxu1  ;;  %v593_v57 = vmul.f32 %v569_v51, %v569_v51 }
 0x23f   : > { %v564_v58 = vadd.f32 %v811_v49, %v563_v56  ;;  %v591_v59 = vmul.f32 %v561_v53, %v561_v53 }
 0x240   : > { %603 = vadd.xlane.f32.xlu1 %v593_v57  ;;  %v594_v60 = vmul.f32 %v572_v55, %v572_v55 }
 0x241   : > { %599 = vadd.xlane.f32.xlu0 %v591_v59  ;;  %v592_v62 = vmul.f32 %v564_v58, %v564_v58 }
 0x243   : > { %v936_v61 = vpop.f32.mrb[4].mxu1 }
 0x244   : > { %605 = vadd.xlane.f32.xlu1 %v594_v60  ;;  %v576_v63 = vpop.f32.mrb[5].mxu1  ;;  %v585_v3 = vadd.f32 %v936_v61, %v811_v49 }
 0x245   : > { %v577_v0 = vadd.f32 %v811_v49, %v576_v63  ;;  %v937_v1 = vpop.f32.mrb[6].mxu1  ;;  %601 = vadd.xlane.f32.xlu0 %v592_v62 }
 0x246   : > { %v579_v2 = vpop.f32.mrb[7].mxu1  ;;  %v588_v6 = vadd.f32 %v937_v1, %v811_v49  ;;  %v597_v8 = vmul.f32 %v585_v3, %v585_v3 }
 0x247   : > { %v580_v4 = vadd.f32 %v811_v49, %v579_v2  ;;  %v595_v5 = vmul.f32 %v577_v0, %v577_v0 }
 0x248   : > { %v598_v9 = vmul.f32 %v588_v6, %v588_v6 }
 0x249   : > { %607 = vadd.xlane.f32.xlu0 %v595_v5  ;;  %v596_v7 = vmul.f32 %v580_v4, %v580_v4 }
 0x24b   : > { %609 = vadd.xlane.f32.xlu1 %v596_v7 }
 0x24d   : > { %611 = vadd.xlane.f32.xlu0 %v597_v8 }
 0x24f   : > { %613 = vadd.xlane.f32.xlu1 %v598_v9 }
 0x2cd   : > { %v604_v10 = vpop.xlane.xlu1 %603 }
 0x2ce   : > { %v617_v11 = vmax.f32 %v604_v10, 1e-24  ;;  %v600_v12 = vpop.xlane.xlu0 %599 }
 0x2cf   : > { %v615_v13 = vmax.f32 %v600_v12, 1e-24 }
 0x2d0   : > { %1029 = vrsqrt.f32 %v617_v11 }
 0x2d1   : > { %v606_v14 = vpop.xlane.xlu1 %605  ;;  %1031 = vrsqrt.f32 %v615_v13 }
 0x2d2   : > { %v618_v15 = vmax.f32 %v606_v14, 1e-24  ;;  %v602_v16 = vpop.xlane.xlu0 %601 }
 0x2d3   : > { %v616_v17 = vmax.f32 %v602_v16, 1e-24 }
 0x2d4   : > { %1033 = vrsqrt.f32 %v618_v15 }
 0x2d5   : > { %1035 = vrsqrt.f32 %v616_v17 }
 0x2d6   : > { %v608_v18 = vpop.xlane.xlu0 %607 }
 0x2d7   : > { %v619_v19 = vmax.f32 %v608_v18, 1e-24 }
 0x2d8   : > { %v610_v20 = vpop.xlane.xlu1 %609 }
 0x2d9   : > { %1037 = vrsqrt.f32 %v619_v19  ;;  %v620_v21 = vmax.f32 %v610_v20, 1e-24 }
 0x2da   : > { %v612_v22 = vpop.xlane.xlu0 %611  ;;  %v1030_v24 = vpop.eup %1029 }
 0x2db   : > { %1039 = vrsqrt.f32 %v620_v21  ;;  %v621_v23 = vmax.f32 %v612_v22, 1e-24  ;;  %v1032_v26 = vpop.eup %1031  ;;  %v633_v30 = vmul.f32 %v1030_v24, %v569_v51 }
 0x2dc   : > { %v614_v25 = vpop.xlane.xlu1 %613  ;;  %v631_v32 = vmul.f32 %v1032_v26, %v561_v53 }
 0x2dd   : > { %1041 = vrsqrt.f32 %v621_v23  ;;  %v622_v27 = vmax.f32 %v614_v25, 1e-24 }
 0x2de   : > { %v1034_v28 = vpop.eup %1033 }
 0x2df   : > { %v1036_v29 = vpop.eup %1035  ;;  %v634_v31 = vmul.f32 %v1034_v28, %v572_v55  ;;  %1043 = vrsqrt.f32 %v622_v27 }
 0x2e0   : > { %v632_v33 = vmul.f32 %v1036_v29, %v564_v58 }
 0x2e1   : > { %v851_v34 = vpack.c.bf16 %v634_v31, %v633_v30 }
 0x2e2   : > { %v846_v35 = vpack.c.bf16 %v632_v33, %v631_v32 }
 0x2e3   : > { %v1038_v36 = vpop.eup %1037  ;;  %863 = vst [vmem:[%s271_s10 + $0x8] sm:$0xff] %v851_v34  }
 0x2e4   : > { %847 = vst [vmem:[%s271_s10] sm:$0xff] %v846_v35   ;;  %v635_v38 = vmul.f32 %v1038_v36, %v577_v0 }
 0x2e5   : > { %v1040_v37 = vpop.eup %1039 }
 0x2e6   : > { %v636_v39 = vmul.f32 %v1040_v37, %v580_v4 }
 0x2e7   : > { %v1042_v40 = vpop.eup %1041 }
 0x2e8   : > { %v856_v41 = vpack.c.bf16 %v636_v39, %v635_v38  ;;  %v637_v43 = vmul.f32 %v1042_v40, %v585_v3 }
 0x2e9   : > { %v1044_v42 = vpop.eup %1043 }
 0x2ea   : > { %864 = vst [vmem:[%s271_s10 + $0x10] sm:$0xff] %v856_v41   ;;  %v638_v44 = vmul.f32 %v1044_v42, %v588_v6 }
 0x2ec   : > { %v861_v45 = vpack.c.bf16 %v638_v44, %v637_v43 }
 0x2ee   : > { %865 = vst [vmem:[%s271_s10 + $0x18] sm:$0xff] %v861_v45  }
 0x2ef   : > { %1144 = shalt.err (!%p1141_p1)
}
 0x2f0   : > { %s1145_s12 = scalar_lea.hbm %s1454_s11, 512  ;;  %s1149_s15 = scalar_lea.hbm %s1505_s5, 1024 }
 0x2f1   : > { %p1146_p13 = scmp.ne.s32.totalorder %s1454_s11, %s1145_s12  ;;  %p1150_p4 = scmp.lt.u32.totalorder %s1454_s11, %s1505_s5 }
 0x2f2   : > { %p1151_p5 = scmp.lt.u32.totalorder %s1149_s15, %s1145_s12  ;;  %p1153_p11 = scmp.lt.u32.totalorder %s1145_s12, %s1454_s11 }
 0x2f3   : > { %p1147_p6 = pnand %p1146_p13, %p1519_p0 }
 0x2f4   : > { %p1152_p8 = por %p1151_p5, %p1150_p4 }
 0x2f5   : > { %p1148_p10 = pneg %p1147_p6 }
 0x2f6   : > { %p1154_p2 = por %p1153_p11, %p1152_p8 }
 0x2f8   : > { %p1155_p3 = pnand %p1154_p2, %p1148_p10 }
 0x2fa   : > { %1158 = shalt.err (!%p1155_p3)
}
 0x2fb   : > { %s1209_s28 = smov 64   ;;  %s1210_s9 = smov 4  }
 0x2fc   : > { %948 = dma.vmem_to_hbm [thread:$0]  (%p1519_p0), %s1456_s13, 512, %s1454_s11, %s680_s17, %s1209_s28, %s1209_s28, %s1210_s9  }
 0x2fd PF: > { %s708_s30 = sand.u32 1, %s1189_s18   ;;  %p1520_p7 = scmp.ne.s32.totalorder %s1510_s25, 0 }
 0x2fe   : > { %p1521_p9 = scmp.ge.s32.totalorder %s1201_s21, 2  ;;  %s709_s7 = scalar_lea.sflag [#allocation4], %s708_s30 }
 0x300   : > { %p962_p12 = pnand %p1521_p9, %p1520_p7 }
 0x302   : > { %1184 = dma.done.wait (!%p962_p12), %s709_s7, 512  }
 0x303   : > { %1186 = vsyncadd (!%p962_p12), %s709_s7, 4294966784  ;;  %p19_p1 = scmp.ge.s32.totalorder %s1357_s29, 4   ;;  %s1522_s18 = smov %s1193_s19 }
 0x304   : > { %s1523_s19 = smov %s1197_s20  ;;  %s1524_s20 = smov %s1373_s27 }
 0x305   : > { %s1525_s21 = smov %s1357_s29  ;;  %21 = sbr.rel (!%p19_p1) target bundleno = 6 (0x6), region = 93 }
 0x30c   :  { %714 = vsyncpa [#allocation3], 1 }
 0x30d   :  { %716 = vsyncpa [#allocation3 + $0x1], 1 }
 0x30e   :  { %717 = vsyncpa [#allocation6], 1 }
 0x30f   :  { %718 = vsyncpa [#allocation4], 1 }
 0x310   :  { %720 = vsyncpa [#allocation4 + $0x1], 1 }

</bundles_post_ra>
